<compile_context>
chip_gen: v5e
topology: v5e:2x2
jax: 0.10.0
libtpu: 0.0.40
codegen_flags: <defaults>
</compile_context>

<pallas_src>
import jax
import jax.numpy as jnp
from jax.experimental import pallas as pl
from jax.experimental.pallas import tpu as pltpu


def _round_up(n, m):
    return ((n + m - 1) // m) * m


def _sigmoid(z):
    # sigmoid(z) = 0.5 * (tanh(z/2) + 1): one EUP op per element (vs exp + rcp).
    return 0.5 * (jnp.tanh(0.5 * z) + 1.0)


def _default_pack_factor():
    """MXU packing factor: 8 for 256-deep MXUs (v6e/v7x), 4 otherwise (v5e etc.)."""
    try:
        kind = jax.devices()[0].device_kind.lower()
    except Exception:
        return 8
    return 8 if ("v6" in kind or "v7" in kind) else 4


def _make_kernel(matmul_dtype, hidden_act_dtype):
    def mlp_kernel(x_ref, w1_ref, b1_ref, w2_ref, b2_ref, w3_ref, b3_ref, o_ref):
        # x block arrives packed as [TB/k, k*F] float32 (free wrapper reshape);
        # cast to bf16 here so the wrapper never re-materializes x in HBM.
        xb = x_ref[...].astype(matmul_dtype)
        # layer 1 (block-diagonal packed weights): [TB/k, kF] @ [kF, kH1]
        z1 = (jnp.dot(xb, w1_ref[...], preferred_element_type=jnp.float32)
              + b1_ref[...])
        h1 = _sigmoid(z1.astype(hidden_act_dtype))
        # layer 2: [TB/k, kH1] @ [kH1, kH2]
        z2 = (jnp.dot(h1.astype(matmul_dtype), w2_ref[...],
                      preferred_element_type=jnp.float32)
              + b2_ref[...])
        h2 = _sigmoid(z2.astype(hidden_act_dtype)).astype(jnp.float32)
        # output layer (N = 1 per sample): tiny block-diagonal [kH2, k] matmul
        # kept fully in f32 so the decision-critical last layer stays exact.
        z3 = (jnp.dot(h2, w3_ref[...], preferred_element_type=jnp.float32)
              + b3_ref[...])
        o_ref[...] = _sigmoid(z3).astype(o_ref.dtype)

    return mlp_kernel


def nn_binclass_forward(x, params, *, block_b=32768, pack_k=None,
                        matmul_dtype=jnp.bfloat16,
                        hidden_act_dtype=jnp.float32):
    """Inference forward of NN_BinClass.

    x: [B, F] float32. params in PyTorch nn.Linear layout: w{i} [out, in], b{i} [out].
    On v6e/v7x, hidden_act_dtype=jnp.bfloat16 halves EUP/VPU epilogue cost
    (do NOT use on v5e: no bf16 VPU/EUP path); default stays f32 for accuracy.
    """
    B, F = x.shape
    w1, b1 = params["w1"], params["b1"]
    w2, b2 = params["w2"], params["b2"]
    w3, b3 = params["w3"], params["b3"]
    H1, H2 = w1.shape[0], w2.shape[0]

    k = _default_pack_factor() if pack_k is None else pack_k
    align = 8 * k                         # TB/k must be a sublane (8) multiple

    # Balanced batch blocks: padding <= align-1 rows; >= 2 grid steps when
    # possible so the "parallel" batch axis can use both v7x TensorCores.
    nblocks = max(pl.cdiv(B, block_b), min(2, pl.cdiv(B, align)))
    TB = _round_up(pl.cdiv(B, nblocks), align)
    Bp = nblocks * TB
    TBk = TB // k

    if Bp != B:
        # Only the small remainder is padded; no transpose / dtype pass over x.
        x = jnp.pad(x, ((0, Bp - B), (0, 0)))
    # Contiguous row-major reshape (metadata only): k samples per packed row.
    xp = x.reshape(Bp // k, k * F)

    # Block-diagonal packed weights (built once from the tiny layer weights) so
    # every MXU pass uses k*F / k*H1 contraction rows instead of F / H1.
    eye = jnp.eye(k, dtype=jnp.float32)
    w1bd = jnp.kron(eye, w1.T.astype(jnp.float32)).astype(matmul_dtype)  # [kF,  kH1]
    w2bd = jnp.kron(eye, w2.T.astype(jnp.float32)).astype(matmul_dtype)  # [kH1, kH2]
    w3bd = jnp.kron(eye, w3.T.astype(jnp.float32))                       # [kH2, k] f32
    b1bd = jnp.tile(b1.astype(jnp.float32), k).reshape(1, k * H1)
    b2bd = jnp.tile(b2.astype(jnp.float32), k).reshape(1, k * H2)
    b3bd = jnp.tile(b3.astype(jnp.float32), k).reshape(1, k)

    resident = lambda i: (0, 0)            # weights/biases stay VMEM-resident
    grid = (nblocks,)

    xblk_bytes = TBk * k * F * 4
    vmem_limit = int(max(32 << 20, min(100 << 20, 12 * xblk_bytes)))

    cost = pl.CostEstimate(
        flops=2 * Bp * (F * H1 + H1 * H2 + H2),
        transcendentals=Bp * (H1 + H2 + 1),
        bytes_accessed=(xp.size * 4 + Bp * 4
                        + (w1bd.size + w2bd.size) * jnp.dtype(matmul_dtype).itemsize
                        + (w3bd.size + b1bd.size + b2bd.size + b3bd.size) * 4),
    )

    out = pl.pallas_call(
        _make_kernel(matmul_dtype, hidden_act_dtype),
        out_shape=jax.ShapeDtypeStruct((Bp // k, k), jnp.float32),
        grid=grid,
        in_specs=[
            pl.BlockSpec((TBk, k * F), lambda i: (i, 0)),   # x blocks (auto-pipelined)
            pl.BlockSpec((k * F, k * H1), resident),        # W1 block-diag
            pl.BlockSpec((1, k * H1), resident),            # b1 (tiled)
            pl.BlockSpec((k * H1, k * H2), resident),       # W2 block-diag
            pl.BlockSpec((1, k * H2), resident),            # b2 (tiled)
            pl.BlockSpec((k * H2, k), resident),            # w3 block-diag (f32)
            pl.BlockSpec((1, k), resident),                 # b3 (tiled)
        ],
        out_specs=pl.BlockSpec((TBk, k), lambda i: (i, 0)),
        compiler_params=pltpu.CompilerParams(
            dimension_semantics=("parallel",),              # v7x: shard over 2 TCs
            vmem_limit_bytes=vmem_limit,
        ),
        cost_estimate=cost,
    )(xp, w1bd, b1bd, w2bd, b2bd, w3bd, b3bd)

    # Packed [Bp/k, k] rows flatten back to sample order; slice off padding.
    return out.reshape(Bp, 1)[:B]


def init_params(key, input_size, first_layer_size):
    """nn.Linear default init U(-1/sqrt(fan_in), 1/sqrt(fan_in)); PyTorch layout."""
    h1 = round(first_layer_size)
    h2 = round(first_layer_size / 2)
    dims = [(input_size, h1), (h1, h2), (h2, 1)]
    params = {}
    for idx, (fan_in, fan_out) in enumerate(dims, start=1):
        key, kw, kb = jax.random.split(key, 3)
        bound = 1.0 / (fan_in ** 0.5)
        params[f"w{idx}"] = jax.random.uniform(
            kw, (fan_out, fan_in), jnp.float32, -bound, bound)
        params[f"b{idx}"] = jax.random.uniform(
            kb, (fan_out,), jnp.float32, -bound, bound)
    return params


if __name__ == "__main__":
    key = jax.random.PRNGKey(0)
    key, kx = jax.random.split(key)

    B = 8
    INPUT_SIZE = 32
    FIRST_LAYER_SIZE = 32      # -> hidden2 = 16 -> output = 1

    params = init_params(key, INPUT_SIZE, FIRST_LAYER_SIZE)
    x = jax.random.normal(kx, (B, INPUT_SIZE), jnp.float32)

    out = nn_binclass_forward(x, params)
    out = jax.block_until_ready(out)

    # Reference in plain JAX (f32, exact sigmoid).
    def ref(x, p):
        s = lambda z: 1.0 / (1.0 + jnp.exp(-z))
        h1 = s(x @ p["w1"].T + p["b1"])
        h2 = s(h1 @ p["w2"].T + p["b2"])
        return s(h2 @ p["w3"].T + p["b3"])

    expected = ref(x, params)
    assert out.shape == (B, 1), out.shape
    err = float(jnp.max(jnp.abs(out - expected)))
    # bf16 matmul operands for the two hidden layers; f32 output layer + exact
    # tanh-based sigmoid keep the error well inside this bound.
    assert err < 5e-3, f"max |err| = {err}"
    print("KERNEL_OK")
</pallas_src>

<mosaic_0001>
module attributes {stable_mosaic.version = 11 : i64} {
  func.func @mlp_kernel(%arg0: i32, %arg1: memref<8x128xf32, #tpu.memory_space<vmem>>, %arg2: memref<128x128xbf16, #tpu.memory_space<vmem>>, %arg3: memref<1x128xf32, #tpu.memory_space<vmem>>, %arg4: memref<128x64xbf16, #tpu.memory_space<vmem>>, %arg5: memref<1x64xf32, #tpu.memory_space<vmem>>, %arg6: memref<64x4xf32, #tpu.memory_space<vmem>>, %arg7: memref<1x4xf32, #tpu.memory_space<vmem>>, %arg8: memref<8x4xf32, #tpu.memory_space<vmem>>) attributes {dimension_semantics = [#tpu.dimension_semantics<parallel>], iteration_bounds = array<i64: 1>, scalar_prefetch = 0 : i64, scratch_operands = 0 : i64, tpu.core_type = #tpu.core_type<tc>, window_params = [{transform_indices = @transform_0, window_bounds = array<i64: 8, 128>}, {pipeline_mode = #tpu.pipeline_mode<synchronous>, transform_indices = @transform_1, window_bounds = array<i64: 128, 128>}, {pipeline_mode = #tpu.pipeline_mode<synchronous>, transform_indices = @transform_2, window_bounds = array<i64: 1, 128>}, {pipeline_mode = #tpu.pipeline_mode<synchronous>, transform_indices = @transform_3, window_bounds = array<i64: 128, 64>}, {pipeline_mode = #tpu.pipeline_mode<synchronous>, transform_indices = @transform_4, window_bounds = array<i64: 1, 64>}, {pipeline_mode = #tpu.pipeline_mode<synchronous>, transform_indices = @transform_5, window_bounds = array<i64: 64, 4>}, {pipeline_mode = #tpu.pipeline_mode<synchronous>, transform_indices = @transform_6, window_bounds = array<i64: 1, 4>}, {transform_indices = @transform_7, window_bounds = array<i64: 8, 4>}]} {
    %c0 = arith.constant 0 : index
    %c0_0 = arith.constant 0 : index
    %0 = vector.load %arg1[%c0, %c0_0] : memref<8x128xf32, #tpu.memory_space<vmem>>, vector<8x128xf32>
    %1 = arith.truncf %0 : vector<8x128xf32> to vector<8x128xbf16>
    %c0_1 = arith.constant 0 : index
    %c0_2 = arith.constant 0 : index
    %2 = vector.load %arg2[%c0_1, %c0_2] : memref<128x128xbf16, #tpu.memory_space<vmem>>, vector<128x128xbf16>
    %cst = arith.constant dense<0.000000e+00> : vector<8x128xf32>
    %3 = tpu.matmul %1, %2, %cst {dimension_numbers = #tpu.dot_dimension_numbers<[1], [0], [0], [1], [0, 0, 1, 1], [], []>} : vector<8x128xbf16>, vector<128x128xbf16>, vector<8x128xf32> -> vector<8x128xf32>
    %c0_3 = arith.constant 0 : index
    %c0_4 = arith.constant 0 : index
    %4 = vector.load %arg3[%c0_3, %c0_4] : memref<1x128xf32, #tpu.memory_space<vmem>>, vector<1x128xf32>
    %5 = vector.broadcast %4 : vector<1x128xf32> to vector<8x128xf32>
    %6 = arith.addf %3, %5 : vector<8x128xf32>
    %cst_5 = arith.constant 5.000000e-01 : f32
    %7 = vector.broadcast %cst_5 : f32 to vector<8x128xf32>
    %8 = arith.mulf %7, %6 : vector<8x128xf32>
    %9 = math.tanh %8 : vector<8x128xf32>
    %cst_6 = arith.constant 1.000000e+00 : f32
    %10 = vector.broadcast %cst_6 : f32 to vector<8x128xf32>
    %11 = arith.addf %9, %10 : vector<8x128xf32>
    %cst_7 = arith.constant 5.000000e-01 : f32
    %12 = vector.broadcast %cst_7 : f32 to vector<8x128xf32>
    %13 = arith.mulf %12, %11 : vector<8x128xf32>
    %14 = arith.truncf %13 : vector<8x128xf32> to vector<8x128xbf16>
    %c0_8 = arith.constant 0 : index
    %c0_9 = arith.constant 0 : index
    %15 = vector.load %arg4[%c0_8, %c0_9] : memref<128x64xbf16, #tpu.memory_space<vmem>>, vector<128x64xbf16>
    %cst_10 = arith.constant dense<0.000000e+00> : vector<8x64xf32>
    %16 = tpu.matmul %14, %15, %cst_10 {dimension_numbers = #tpu.dot_dimension_numbers<[1], [0], [0], [1], [0, 0, 1, 1], [], []>} : vector<8x128xbf16>, vector<128x64xbf16>, vector<8x64xf32> -> vector<8x64xf32>
    %c0_11 = arith.constant 0 : index
    %c0_12 = arith.constant 0 : index
    %17 = vector.load %arg5[%c0_11, %c0_12] : memref<1x64xf32, #tpu.memory_space<vmem>>, vector<1x64xf32>
    %18 = vector.broadcast %17 : vector<1x64xf32> to vector<8x64xf32>
    %19 = arith.addf %16, %18 : vector<8x64xf32>
    %cst_13 = arith.constant 5.000000e-01 : f32
    %20 = vector.broadcast %cst_13 : f32 to vector<8x64xf32>
    %21 = arith.mulf %20, %19 : vector<8x64xf32>
    %22 = math.tanh %21 : vector<8x64xf32>
    %cst_14 = arith.constant 1.000000e+00 : f32
    %23 = vector.broadcast %cst_14 : f32 to vector<8x64xf32>
    %24 = arith.addf %22, %23 : vector<8x64xf32>
    %cst_15 = arith.constant 5.000000e-01 : f32
    %25 = vector.broadcast %cst_15 : f32 to vector<8x64xf32>
    %26 = arith.mulf %25, %24 : vector<8x64xf32>
    %c0_16 = arith.constant 0 : index
    %c0_17 = arith.constant 0 : index
    %27 = vector.load %arg6[%c0_16, %c0_17] : memref<64x4xf32, #tpu.memory_space<vmem>>, vector<64x4xf32>
    %cst_18 = arith.constant dense<0.000000e+00> : vector<8x4xf32>
    %28 = tpu.matmul %26, %27, %cst_18 {dimension_numbers = #tpu.dot_dimension_numbers<[1], [0], [0], [1], [0, 0, 1, 1], [], []>} : vector<8x64xf32>, vector<64x4xf32>, vector<8x4xf32> -> vector<8x4xf32>
    %c0_19 = arith.constant 0 : index
    %c0_20 = arith.constant 0 : index
    %29 = vector.load %arg7[%c0_19, %c0_20] : memref<1x4xf32, #tpu.memory_space<vmem>>, vector<1x4xf32>
    %30 = vector.broadcast %29 : vector<1x4xf32> to vector<8x4xf32>
    %31 = arith.addf %28, %30 : vector<8x4xf32>
    %cst_21 = arith.constant 5.000000e-01 : f32
    %32 = vector.broadcast %cst_21 : f32 to vector<8x4xf32>
    %33 = arith.mulf %32, %31 : vector<8x4xf32>
    %34 = math.tanh %33 : vector<8x4xf32>
    %cst_22 = arith.constant 1.000000e+00 : f32
    %35 = vector.broadcast %cst_22 : f32 to vector<8x4xf32>
    %36 = arith.addf %34, %35 : vector<8x4xf32>
    %cst_23 = arith.constant 5.000000e-01 : f32
    %37 = vector.broadcast %cst_23 : f32 to vector<8x4xf32>
    %38 = arith.mulf %37, %36 : vector<8x4xf32>
    %c0_24 = arith.constant 0 : index
    %c0_25 = arith.constant 0 : index
    %39 = vector.load %arg8[%c0_24, %c0_25] : memref<8x4xf32, #tpu.memory_space<vmem>>, vector<8x4xf32>
    tpu.vector_store %arg8[%c0_24, %c0_25], %38 {strides = array<i32>} : memref<8x4xf32, #tpu.memory_space<vmem>>, vector<8x4xf32>,
    return
  }
  func.func @transform_0(%arg0: i32) -> (i32, i32) {
    %c0_i32 = arith.constant 0 : i32
    %c0_i32_0 = arith.constant 0 : i32
    return %arg0, %c0_i32 : i32, i32
  }
  func.func @transform_1(%arg0: i32) -> (i32, i32) {
    %c0_i32 = arith.constant 0 : i32
    %c0_i32_0 = arith.constant 0 : i32
    %c0_i32_1 = arith.constant 0 : i32
    return %c0_i32, %c0_i32_0 : i32, i32
  }
  func.func @transform_2(%arg0: i32) -> (i32, i32) {
    %c0_i32 = arith.constant 0 : i32
    %c0_i32_0 = arith.constant 0 : i32
    %c0_i32_1 = arith.constant 0 : i32
    return %c0_i32, %c0_i32_0 : i32, i32
  }
  func.func @transform_3(%arg0: i32) -> (i32, i32) {
    %c0_i32 = arith.constant 0 : i32
    %c0_i32_0 = arith.constant 0 : i32
    %c0_i32_1 = arith.constant 0 : i32
    return %c0_i32, %c0_i32_0 : i32, i32
  }
  func.func @transform_4(%arg0: i32) -> (i32, i32) {
    %c0_i32 = arith.constant 0 : i32
    %c0_i32_0 = arith.constant 0 : i32
    %c0_i32_1 = arith.constant 0 : i32
    return %c0_i32, %c0_i32_0 : i32, i32
  }
  func.func @transform_5(%arg0: i32) -> (i32, i32) {
    %c0_i32 = arith.constant 0 : i32
    %c0_i32_0 = arith.constant 0 : i32
    %c0_i32_1 = arith.constant 0 : i32
    return %c0_i32, %c0_i32_0 : i32, i32
  }
  func.func @transform_6(%arg0: i32) -> (i32, i32) {
    %c0_i32 = arith.constant 0 : i32
    %c0_i32_0 = arith.constant 0 : i32
    %c0_i32_1 = arith.constant 0 : i32
    return %c0_i32, %c0_i32_0 : i32, i32
  }
  func.func @transform_7(%arg0: i32) -> (i32, i32) {
    %c0_i32 = arith.constant 0 : i32
    %c0_i32_0 = arith.constant 0 : i32
    return %arg0, %c0_i32 : i32, i32
  }
}

</mosaic_0001>

<bundles_post_ra>
// kernel: tpu_custom_call.1
= control target key start
LH: loop header
LB: loop body
LE: loop exit
PB: predicated region body
PF: predicated region fallthrough
CT: control target
= control target key end

     0   :  { %vm211_vm0 = vcmask 523264   ;;  %vm239_vm1 = vcmask 31744   ;;  %s462_s1 = inlined_call_operand.vmem [shape: bf16[128,128], index: 1, kind: input, shape index: {}]   ;;  %s463_s3 = inlined_call_operand.vmem [shape: bf16[128,64], index: 3, kind: input, shape index: {}]   ;;  %s464_s2 = inlined_call_operand.vmem [shape: f32[1,128], index: 2, kind: input, shape index: {}]   ;;  %s465_s0 = inlined_call_operand.vmem [shape: f32[8,128], index: 0, kind: input, shape index: {}]   ;;  %s466_s4 = inlined_call_operand.vmem [shape: f32[1,64], index: 4, kind: input, shape index: {}]   ;;  %s467_s6 = inlined_call_operand.vmem [shape: f32[1,4], index: 6, kind: input, shape index: {}]   ;;  %s468_s5 = inlined_call_operand.vmem [shape: f32[64,4], index: 5, kind: input, shape index: {}]   ;;  %s469_s7 = inlined_call_operand.vmem [shape: f32[8,4], index: 7, kind: output, shape index: {}]  }
   0x1   :  { %v317_v0 = vld [vmem:[%s462_s1 + $0x38] sm:$0xff]  ;;  %v316_v1 = vld [vmem:[%s462_s1 + $0x30] sm:$0xff]  ;;  %v315_v4 = vld [vmem:[%s462_s1 + $0x28] sm:$0xff] }
   0x2   :  { %96 = vmatpush.bf16.msra.mxu0 %v317_v0  ;;  %v325_v2 = vld [vmem:[%s463_s3 + $0x38] sm:$0xff]  ;;  %v324_v3 = vld [vmem:[%s463_s3 + $0x30] sm:$0xff]  ;;  %v323_v5 = vld [vmem:[%s463_s3 + $0x28] sm:$0xff] }
   0x3   :  { %182 = vmatpush.bf16.msra.mxu1 %v325_v2  ;;  %v314_v6 = vld [vmem:[%s462_s1 + $0x20] sm:$0xff]  ;;  %v313_v8 = vld [vmem:[%s462_s1 + $0x18] sm:$0xff]  ;;  %v312_v9 = vld [vmem:[%s462_s1 + $0x10] sm:$0xff] }
   0x4   :  { %v322_v7 = vld [vmem:[%s463_s3 + $0x20] sm:$0xff]  ;;  %v311_v10 = vld [vmem:[%s462_s1 + $0x8] sm:$0xff]  ;;  %v321_v14 = vld [vmem:[%s463_s3 + $0x18] sm:$0xff] }
   0x5   :  { %v310_v11 = vld [vmem:[%s462_s1] sm:$0xff]  ;;  %v320_v15 = vld [vmem:[%s463_s3 + $0x10] sm:$0xff]  ;;  %v319_v16 = vld [vmem:[%s463_s3 + $0x8] sm:$0xff] }
   0x6   :  { %97 = vmatpush.bf16.msra.mxu0 %v316_v1  ;;  %v26_v12 = vld [vmem:[%s465_s0] sm:$0xff]  ;;  %v206_v27 = vld [vmem:[%s468_s5 + $0x38] sm:$0xff]  ;;  %v205_v28 = vld [vmem:[%s468_s5 + $0x30] sm:$0xff] }
   0x7   :  { %183 = vmatpush.bf16.msra.mxu1 %v324_v3  ;;  %v27_v13 = vpack.c.bf16 %v26_v12, %v26_v12  ;;  %v318_v17 = vld [vmem:[%s463_s3] sm:$0xff]  ;;  %223 = vmatpush.msra.mxu2 %v206_v27  ;;  %v204_v29 = vld [vmem:[%s468_s5 + $0x28] sm:$0xff]  ;;  %v202_v31 = vld [vmem:[%s468_s5 + $0x18] sm:$0xff] }
   0x8   :  { %v326_v18 = vld [vmem:[%s464_s2] ss:$0 sm:$0xff]  ;;  %v201_v32 = vld [vmem:[%s468_s5 + $0x10] sm:$0xff]  ;;  %v200_v33 = vld [vmem:[%s468_s5 + $0x8] sm:$0xff] }
   0x9   :  { %224 = vmatpush.msra.mxu2 %v205_v28  ;;  %v203_v30 = vld [vmem:[%s468_s5 + $0x20] sm:$0xff] }
   0xa   :  { %98 = vmatpush.bf16.msra.mxu0 %v315_v4  ;;  %v199_v34 = vld [vmem:[%s468_s5] sm:$0xff] }
   0xb   :  { %184 = vmatpush.bf16.msra.mxu1 %v323_v5  ;;  %225 = vmatpush.msra.mxu2 %v204_v29  ;;  %v327_v35 = vld [vmem:[%s466_s4] ss:$0 sm:$0xff] }
   0xc   :  { %v328_v43 = vld [vmem:[%s467_s6] ss:$0 sm:$0xff] }
   0xd   :  { %226 = vmatpush.msra.mxu2 %v203_v30 }
   0xe   :  { %99 = vmatpush.bf16.msra.mxu0 %v314_v6 }
   0xf   :  { %185 = vmatpush.bf16.msra.mxu1 %v322_v7  ;;  %227 = vmatpush.msra.mxu2 %v202_v31 }
  0x11   :  { %228 = vmatpush.msra.mxu2 %v201_v32 }
  0x12   :  { %100 = vmatpush.bf16.msra.mxu0 %v313_v8 }
  0x13   :  { %186 = vmatpush.bf16.msra.mxu1 %v321_v14  ;;  %229 = vmatpush.msra.mxu2 %v200_v33 }
  0x15   :  { %230 = vmatpush.msra.mxu2 %v199_v34 }
  0x16   :  { %101 = vmatpush.bf16.msra.mxu0 %v312_v9 }
  0x17   :  { %187 = vmatpush.bf16.msra.mxu1 %v320_v15 }
  0x1a   :  { %102 = vmatpush.bf16.msra.mxu0 %v311_v10 }
  0x1b   :  { %188 = vmatpush.bf16.msra.mxu1 %v319_v16 }
  0x1e   :  { %103 = vmatpush.bf16.msra.mxu0 %v310_v11 }
  0x1f   :  { %189 = vmatpush.bf16.msra.mxu1 %v318_v17 }
  0x21   :  { %104 = vmatmul.bf16.vlgmr.msra.gmra.mxu0 %v27_v13 }
  0x9e   :  { %v105_v19 = vpop.f32.mrf.mxu0 }
  0x9f   :  { %v106_v20 = vadd.f32 %v326_v18, %v105_v19 }
  0xa1   :  { %v109_v21 = vmul.f32 0.5, %v106_v20 }
  0xa3   :  { %329 = vtanh.f32 %v109_v21 }
  0xa6   :  { %v107_v22 = vpop.f32.mrf.mxu0 }
  0xa9   :  { %v330_v23 = vpop.eup %329 }
  0xaa   :  { %v111_v24 = vadd.f32 1.0, %v330_v23 }
  0xac   :  { %v112_v25 = vmul.f32 0.5, %v111_v24 }
  0xae   :  { %v113_v26 = vpack.c.bf16 %v112_v25, %v112_v25 }
  0xb0   :  { %190 = vmatmul.bf16.vlgmr.msra.gmra.mxu1 %v113_v26 }
 0x12d   :  { %v191_v36 = vpop.f32.mrf.mxu1 }
 0x12e   :  { %v192_v37 = vadd.f32 %v327_v35, %v191_v36 }
 0x130   :  { %v195_v38 = vmul.f32 0.5, %v192_v37 }
 0x132   :  { %331 = vtanh.f32 %v195_v38 }
 0x135   :  { %v193_v39 = vpop.f32.mrf.mxu1 }
 0x138   :  { %v332_v40 = vpop.eup %331 }
 0x139   :  { %v197_v41 = vadd.f32 1.0, %v332_v40 }
 0x13b   :  { %v198_v42 = vmul.f32 0.5, %v197_v41 }
 0x13d   :  { %309 = vmatmul.msk.f32.vlgmr.msra.gmra.mxu2 %vm211_vm0, %v198_v42 }
 0x1c0   :  { %v232_v44 = vpop.f32.mrf.mxu2 }
 0x1c1   :  { %v233_v45 = vadd.f32 %v328_v43, %v232_v44 }
 0x1c3   :  { %v235_v46 = vmul.f32 0.5, %v233_v45 }
 0x1c5   :  { %333 = vtanh.f32 %v235_v46 }
 0x1cb   :  { %v334_v47 = vpop.eup %333 }
 0x1cc   :  { %v237_v48 = vadd.f32 1.0, %v334_v47 }
 0x1ce   :  { %v238_v49 = vmul.f32 0.5, %v237_v48 }
 0x1d0   :  { %240 = vst.msk [vmem:[%s469_s7] sm:$0xff] %vm239_vm1, %v238_v49 }

</bundles_post_ra>
